<compile_context>
chip_gen: v6e
topology: v6e:2x2x1
jax: 0.10.0
libtpu: 0.0.40
codegen_flags: <defaults>
</compile_context>

<pallas_src>
import math
from functools import partial

import jax
import jax.numpy as jnp
from jax import lax
from jax.experimental import pallas as pl
from jax.experimental.pallas import tpu as pltpu


# ----------------------------- small utilities --------------------------------------

_VMEM_LIMIT_CACHE = None


def _vmem_limit():
    """Scoped-VMEM budget: ~3/4 of physical VMEM, capped at 96 MiB.
    ~96 MiB on v5e/v6e (128 MiB physical), ~48 MiB on v7x (64 MiB physical)."""
    global _VMEM_LIMIT_CACHE
    if _VMEM_LIMIT_CACHE is None:
        try:
            cap = int(getattr(pltpu.get_tpu_info(), "vmem_capacity_bytes"))
            _VMEM_LIMIT_CACHE = min((cap * 3) // 4, 96 * 1024 * 1024)
        except Exception:
            _VMEM_LIMIT_CACHE = 32 * 1024 * 1024
    return _VMEM_LIMIT_CACHE


def _round_up(x, m):
    return ((x + m - 1) // m) * m


def _cdiv(a, b):
    return -(-a // b)


def _choose_tile(dim, preferred, align):
    """Largest tile <= preferred that divides `dim` and is a multiple of `align`;
    falls back to the full dimension (always a legal block shape)."""
    if dim <= preferred:
        return dim
    t = (preferred // align) * align
    while t >= align:
        if dim % t == 0:
            return t
        t -= align
    return dim


# --------------------------- tiled linear: y = x @ W + b ----------------------------

def _linear_kernel(x_ref, w_ref, b_ref, o_ref, acc_ref):
    @pl.when(pl.program_id(2) == 0)
    def _init():
        acc_ref[...] = jnp.zeros(acc_ref.shape, acc_ref.dtype)

    acc_ref[...] += jnp.dot(x_ref[...], w_ref[...],
                            preferred_element_type=jnp.float32)

    @pl.when(pl.program_id(2) == pl.num_programs(2) - 1)
    def _finalize():
        o_ref[...] = (acc_ref[...] + b_ref[...].astype(jnp.float32)).astype(o_ref.dtype)


def pallas_linear(x2d, w, b):
    M, K = x2d.shape
    N = w.shape[1]
    tm = _choose_tile(M, 512, 8)
    tk = _choose_tile(K, 512, 128)
    tn = _choose_tile(N, 512, 128)
    grid = (M // tm, N // tn, K // tk)
    return pl.pallas_call(
        _linear_kernel,
        out_shape=jax.ShapeDtypeStruct((M, N), x2d.dtype),
        grid=grid,
        in_specs=[
            pl.BlockSpec((tm, tk), lambda i, j, k: (i, k)),
            pl.BlockSpec((tk, tn), lambda i, j, k: (k, j)),
            pl.BlockSpec((1, tn), lambda i, j, k: (0, j)),
        ],
        out_specs=pl.BlockSpec((tm, tn), lambda i, j, k: (i, j)),
        scratch_shapes=[pltpu.VMEM((tm, tn), jnp.float32)],
        compiler_params=pltpu.CompilerParams(
            dimension_semantics=("parallel", "parallel", "arbitrary"),
            vmem_limit_bytes=_vmem_limit()),
    )(x2d, w, b.reshape(1, N))


# ----------------------- flash attention with online softmax ------------------------

def _flash_mha_kernel(*refs, num_heads, head_dim, scale, has_mask,
                      apply_len_mask, approx_recip):
    if has_mask:
        len_ref, q_ref, k_ref, v_ref, mask_ref, o_ref, m_ref, l_ref, acc_ref = refs
    else:
        len_ref, q_ref, k_ref, v_ref, o_ref, m_ref, l_ref, acc_ref = refs
        mask_ref = None

    kv_i = pl.program_id(2)

    @pl.when(kv_i == 0)
    def _init():
        m_ref[...] = jnp.full(m_ref.shape, -jnp.inf, dtype=m_ref.dtype)
        l_ref[...] = jnp.zeros(l_ref.shape, l_ref.dtype)
        acc_ref[...] = jnp.zeros(acc_ref.shape, acc_ref.dtype)

    # scale folded into q ONCE per tile (not per (S,T) score matrix); operands stay in
    # their storage dtype (bf16 feeds the MXU directly, accumulation is f32).
    q = q_ref[0] * scale                # (tq, H), H = nh*hd, lane-dense
    k = k_ref[0]                        # (tkv, H)
    v = v_ref[0]                        # (tkv, H)
    tkv = k.shape[0]

    neg_big = jnp.float32(-1e20)        # matches torch masked_fill value
    keep = None
    if mask_ref is not None:
        keep = mask_ref[0] != 0         # (tq, tkv), shared by every head

    col_valid = None
    if apply_len_mask:
        # in-kernel padding mask from iota + scalar length (no HBM mask traffic)
        col = lax.broadcasted_iota(jnp.int32, (1, tkv), 1) + kv_i * tkv
        col_valid = col < len_ref[0]

    # TODO(synk): for large num_heads, express this as one batched lax.dot_general
    # ((nh,tq,hd) x (nh,tkv,hd)) to cut code size / improve MXU staging.
    for h in range(num_heads):
        sl = slice(h * head_dim, (h + 1) * head_dim)
        s = lax.dot_general(q[:, sl], k[:, sl], (((1,), (1,)), ((), ())),
                            preferred_element_type=jnp.float32)        # (tq, tkv)
        if keep is not None:
            s = jnp.where(keep, s, neg_big)
        if col_valid is not None:
            s = jnp.where(col_valid, s, -jnp.inf)                      # padded cols
        m_prev = m_ref[h]                                              # (tq, 1)
        m_new = jnp.maximum(m_prev, jnp.max(s, axis=-1, keepdims=True))
        alpha = jnp.exp(m_prev - m_new)
        p = jnp.exp(s - m_new)                                         # (tq, tkv) f32
        l_ref[h] = alpha * l_ref[h] + jnp.sum(p, axis=-1, keepdims=True)
        m_ref[h] = m_new
        pv = jnp.dot(p.astype(v.dtype), v[:, sl],
                     preferred_element_type=jnp.float32)               # (tq, hd)
        # per-head write into the shared (tq, H) scratch slab (no concatenate)
        acc_ref[:, sl] = alpha * acc_ref[:, sl] + pv

    @pl.when(kv_i == pl.num_programs(2) - 1)
    def _finalize():
        for h in range(num_heads):
            sl = slice(h * head_dim, (h + 1) * head_dim)
            inv = pl.reciprocal(l_ref[h], approx=approx_recip)         # EUP
            acc_ref[:, sl] = acc_ref[:, sl] * inv
        o_ref[0] = acc_ref[...].astype(o_ref.dtype)                    # one lane-dense store


def pallas_flash_attention(q_arr, q_col, k_arr, k_col, v_arr, v_col, *,
                           mask, mask_batched, t_valid, num_heads, head_dim,
                           scale, out_dtype, apply_len_mask):
    B = q_arr.shape[0]
    S = q_arr.shape[1]
    H = num_heads * head_dim
    Tbuf = k_arr.shape[1]

    tq = _choose_tile(S, 256, 8)
    # cap resident KV block at 512 rows (v7x-safe) and don't read far past t_valid
    tkv_pref = min(512, _round_up(max(t_valid, 1), 128))
    tkv = _choose_tile(Tbuf, tkv_pref, 128)
    nkv = _cdiv(t_valid, tkv)
    assert nkv * tkv <= Tbuf

    length = jnp.array([t_valid], jnp.int32)           # scalar-prefetch (SMEM)

    in_specs = [
        pl.BlockSpec((1, tq, H), lambda b, qi, ki, L: (b, qi, q_col)),
        pl.BlockSpec((1, tkv, H), lambda b, qi, ki, L: (b, ki, k_col)),
        pl.BlockSpec((1, tkv, H), lambda b, qi, ki, L: (b, ki, v_col)),
    ]
    args = [q_arr, k_arr, v_arr]
    if mask is not None:
        tm_cols = nkv * tkv
        if mask.shape[-1] < tm_cols:                    # pad to the block grid extent
            mask = jnp.pad(mask, ((0, 0), (0, 0), (0, tm_cols - mask.shape[-1])))
        if mask_batched:
            mmap = lambda b, qi, ki, L: (b, qi, ki)
        else:
            mmap = lambda b, qi, ki, L: (0, qi, ki)     # single shared mask
        in_specs.append(pl.BlockSpec((1, tq, tkv), mmap))
        args.append(mask)

    kernel = partial(
        _flash_mha_kernel, num_heads=num_heads, head_dim=head_dim, scale=scale,
        has_mask=mask is not None, apply_len_mask=apply_len_mask,
        approx_recip=(jnp.dtype(out_dtype) == jnp.dtype(jnp.bfloat16)))

    return pl.pallas_call(
        kernel,
        out_shape=jax.ShapeDtypeStruct((B, S, H), out_dtype),
        grid_spec=pltpu.PrefetchScalarGridSpec(
            num_scalar_prefetch=1,
            grid=(B, S // tq, nkv),
            in_specs=in_specs,
            out_specs=pl.BlockSpec((1, tq, H), lambda b, qi, ki, L: (b, qi, 0)),
            scratch_shapes=[pltpu.VMEM((num_heads, tq, 1), jnp.float32),   # m
                            pltpu.VMEM((num_heads, tq, 1), jnp.float32),   # l
                            pltpu.VMEM((tq, H), jnp.float32)]),            # acc slab
        compiler_params=pltpu.CompilerParams(
            dimension_semantics=("parallel", "parallel", "arbitrary"),
            vmem_limit_bytes=_vmem_limit()),
    )(length, *args)


# ------------------------------------ module -----------------------------------------

def _prepare_mask(attention_mask, B, S, T):
    """Returns (int32 mask of shape (1,S,T) or (B,S,T), batched?)."""
    if attention_mask is None:
        return None, False
    am = jnp.asarray(attention_mask)
    if am.ndim == 4:
        am = am[:, 0]     # TODO(synk): per-head attention masks not supported
    if am.ndim == 3 and am.shape[0] == 1:
        am = am[0]
    if am.ndim <= 2:
        am = jnp.broadcast_to(am, (S, T))[None]          # one mask shared by all batches
        batched = False
    else:
        am = jnp.broadcast_to(am, (B, S, T))
        batched = True
    return (am != 0).astype(jnp.int32), batched


class MultiHeadAttentionWithKVCache:
    def __init__(self, hidden_dim, num_heads, key, dtype=jnp.float32,
                 max_cache_len=256):
        self.num_heads = num_heads
        self.head_dim = hidden_dim // num_heads
        self.hidden_dim = hidden_dim
        self.dtype = dtype
        self.max_cache_len = max_cache_len
        ks = jax.random.split(key, 8)
        bound = 1.0 / math.sqrt(hidden_dim)
        init_w = lambda k: jax.random.uniform(k, (hidden_dim, hidden_dim),
                                              jnp.float32, -bound, bound)
        init_b = lambda k: jax.random.uniform(k, (hidden_dim,),
                                              jnp.float32, -bound, bound)
        wq, wk, wv, wo = (init_w(k) for k in ks[:4])
        bq, bk, bv, bo = (init_b(k) for k in ks[4:])
        self.wq, self.wk, self.wv, self.wo = (w.astype(dtype) for w in (wq, wk, wv, wo))
        self.bq, self.bk, self.bv, self.bo = (b.astype(dtype) for b in (bq, bk, bv, bo))
        # fused QKV weight / bias precomputed ONCE
        self.wqkv = jnp.concatenate([self.wq, self.wk, self.wv], axis=1)  # (H, 3H)
        self.bqkv = jnp.concatenate([self.bq, self.bk, self.bv], axis=0)  # (3H,)

    def init_kv_cache(self, batch_size, max_len=None):
        tmax = self.max_cache_len if max_len is None else max_len
        return {'k': jnp.zeros((batch_size, tmax, self.hidden_dim), self.dtype),
                'v': jnp.zeros((batch_size, tmax, self.hidden_dim), self.dtype),
                'pos': 0}

    def __call__(self, X, attention_mask=None, kv_cache=None):
        B, S, H = X.shape
        nh, hd = self.num_heads, self.head_dim
        x2d = X.reshape(B * S, H).astype(self.dtype)

        # fused QKV projection (single tiled / pipelined Pallas matmul)
        qkv = pallas_linear(x2d, self.wqkv, self.bqkv).reshape(B, S, 3 * H)

        fused_ok = (H % 128 == 0)       # lane-aligned -> read Q/K/V straight from qkv
        if fused_ok:
            q_arr, q_col = qkv, 0
        else:
            q_arr, q_col = qkv[:, :, :H], 0

        new_cache = None
        if kv_cache is not None:
            if not kv_cache:            # empty dict -> auto-init (mirrors torch usage)
                kv_cache = self.init_kv_cache(B)
            pos = int(kv_cache['pos'])
            tmax = kv_cache['k'].shape[1]
            assert pos + S <= tmax, "KV cache overflow; increase max_cache_len"
            # TODO(synk): fuse this cache write into a tiny Pallas kernel reading the
            # qkv buffer directly via input_output_aliases + pl.ds(pos, S).
            k_new = qkv[:, :, H:2 * H]
            v_new = qkv[:, :, 2 * H:]
            k_buf = lax.dynamic_update_slice(kv_cache['k'], k_new, (0, pos, 0))
            v_buf = lax.dynamic_update_slice(kv_cache['v'], v_new, (0, pos, 0))
            new_cache = {'k': k_buf, 'v': v_buf, 'pos': pos + S}
            t_valid = pos + S
            k_arr, k_col = k_buf, 0
            v_arr, v_col = v_buf, 0
            apply_len_mask = True
            # TODO(synk): under jit, keep 'pos' as a traced scalar and bound the KV
            # grid with a scalar-prefetch length + pl.when block skip to avoid
            # shape-driven recompiles.
        else:
            t_valid = S
            if fused_ok:
                k_arr, k_col = qkv, 1
                v_arr, v_col = qkv, 2
            else:
                k_arr, k_col = qkv[:, :, H:2 * H], 0
                v_arr, v_col = qkv[:, :, 2 * H:], 0
            apply_len_mask = False

        mask, mask_batched = _prepare_mask(attention_mask, B, S, t_valid)

        out = pallas_flash_attention(
            q_arr, q_col, k_arr, k_col, v_arr, v_col,
            mask=mask, mask_batched=mask_batched, t_valid=t_valid,
            num_heads=nh, head_dim=hd, scale=1.0 / math.sqrt(hd),
            out_dtype=self.dtype, apply_len_mask=apply_len_mask)      # (B, S, H)
        # TODO(synk): att_dropout(p=0.1) omitted — identity in eval mode.

        out = pallas_linear(out.reshape(B * S, H), self.wo, self.bo).reshape(B, S, H)

        if kv_cache is not None:
            return out, new_cache
        return out


# ----------------------------------- reference ---------------------------------------

def ref_forward(m, X, attention_mask=None, ctx_X=None):
    """Pure-JAX f32 reference matching the PyTorch module.  If ctx_X is given, K/V are
    computed over concat([ctx_X, X], axis=1) (the state a KV cache would hold)."""
    B, S, H = X.shape
    f32 = lambda t: jnp.asarray(t, jnp.float32)
    Xq = f32(X)
    Xkv = Xq if ctx_X is None else jnp.concatenate([f32(ctx_X), Xq], axis=1)
    T = Xkv.shape[1]
    Q = Xq @ f32(m.wq) + f32(m.bq)
    K = Xkv @ f32(m.wk) + f32(m.bk)
    V = Xkv @ f32(m.wv) + f32(m.bv)
    q = Q.reshape(B, S, m.num_heads, m.head_dim).transpose(0, 2, 1, 3)
    k = K.reshape(B, T, m.num_heads, m.head_dim).transpose(0, 2, 1, 3)
    v = V.reshape(B, T, m.num_heads, m.head_dim).transpose(0, 2, 1, 3)
    s = jnp.einsum('bhqd,bhkd->bhqk', q, k) / math.sqrt(m.head_dim)
    if attention_mask is not None:
        am = jnp.asarray(attention_mask)
        if am.ndim == 4:
            am = am[:, 0]
        am = jnp.broadcast_to(am, (B, S, T))
        s = jnp.where(am[:, None] == 0, jnp.float32(-1e20), s)
    p = jax.nn.softmax(s, axis=-1)
    o = jnp.einsum('bhqk,bhkd->bhqd', p, v)
    o = o.transpose(0, 2, 1, 3).reshape(B, S, H)
    return o @ f32(m.wo) + f32(m.bo)


# ------------------------------------- main -------------------------------------------

if __name__ == "__main__":
    key = jax.random.PRNGKey(0)
    kp, kx, kp2, kx2 = jax.random.split(key, 4)

    # ---- Test A: small spec-implied shapes (hidden=32 -> un-aligned fallback path) ----
    B, S, HID, NH = 2, 8, 32, 4
    mha = MultiHeadAttentionWithKVCache(HID, NH, kp)
    X = jax.random.normal(kx, (B, S, HID), jnp.float32)

    out = jax.block_until_ready(mha(X))
    ref = ref_forward(mha, X)
    assert jnp.allclose(out, ref, atol=1e-4, rtol=1e-4)

    causal = jnp.tril(jnp.ones((S, S), jnp.float32))
    out_m = jax.block_until_ready(mha(X, attention_mask=causal))
    assert jnp.allclose(out_m, ref_forward(mha, X, attention_mask=causal),
                        atol=1e-4, rtol=1e-4)

    # KV cache: preallocated packed buffers, two decode-like steps
    cache = mha.init_kv_cache(B, max_len=64)
    out1, cache = mha(X, kv_cache=cache)          # context length 8
    out2, cache = mha(X, kv_cache=cache)          # context length 16
    out2 = jax.block_until_ready(out2)
    assert cache['pos'] == 2 * S and cache['k'].shape == (B, 64, HID)
    assert jnp.allclose(out1, ref, atol=1e-4, rtol=1e-4)
    assert jnp.allclose(out2, ref_forward(mha, X, ctx_X=X), atol=1e-4, rtol=1e-4)

    # empty-dict auto-init (mirrors the PyTorch global kv_cache = {} usage)
    out1b, cache_b = mha(X, kv_cache={})
    assert jnp.allclose(jax.block_until_ready(out1b), ref, atol=1e-4, rtol=1e-4)

    # ---- Test B: lane-aligned config (fused-QKV column reads + KV streaming) ----------
    B2, S2, HID2, NH2 = 1, 256, 256, 2
    mha2 = MultiHeadAttentionWithKVCache(HID2, NH2, kp2)
    X2 = jax.random.normal(kx2, (B2, S2, HID2), jnp.float32)

    causal2 = jnp.tril(jnp.ones((S2, S2), jnp.float32))
    out_b = jax.block_until_ready(mha2(X2, attention_mask=causal2))
    assert jnp.allclose(out_b, ref_forward(mha2, X2, attention_mask=causal2),
                        atol=5e-4, rtol=5e-4)

    # three cache steps -> T=768 spans two 512-wide KV blocks incl. padded tail
    cache2 = mha2.init_kv_cache(B2, max_len=1024)
    o1, cache2 = mha2(X2, kv_cache=cache2)
    o2, cache2 = mha2(X2, kv_cache=cache2)
    o3, cache2 = mha2(X2, kv_cache=cache2)
    o3 = jax.block_until_ready(o3)
    ref3 = ref_forward(mha2, X2, ctx_X=jnp.concatenate([X2, X2], axis=1))
    assert jnp.allclose(o3, ref3, atol=5e-4, rtol=5e-4)

    # bf16 storage / f32 accumulation smoke test (loose tolerance)
    mha_bf = MultiHeadAttentionWithKVCache(HID2, NH2, kp2, dtype=jnp.bfloat16)
    Xb = X2.astype(jnp.bfloat16)
    ob = jax.block_until_ready(mha_bf(Xb))
    assert jnp.allclose(ob.astype(jnp.float32), ref_forward(mha_bf, Xb),
                        atol=2e-1, rtol=2e-1)

    print("KERNEL_OK")
</pallas_src>

<mosaic_0001>
module attributes {stable_mosaic.version = 11 : i64} {
  func.func @_linear_kernel(%arg0: i32, %arg1: i32, %arg2: i32, %arg3: memref<16x32xf32, #tpu.memory_space<vmem>>, %arg4: memref<32x96xf32, #tpu.memory_space<vmem>>, %arg5: memref<1x96xf32, #tpu.memory_space<vmem>>, %arg6: memref<16x96xf32, #tpu.memory_space<vmem>>, %arg7: memref<16x96xf32, #tpu.memory_space<vmem>>) attributes {dimension_semantics = [#tpu.dimension_semantics<parallel>, #tpu.dimension_semantics<parallel>, #tpu.dimension_semantics<arbitrary>], iteration_bounds = array<i64: 1, 1, 1>, scalar_prefetch = 0 : i64, scratch_operands = 1 : i64, tpu.core_type = #tpu.core_type<tc>, window_params = [{transform_indices = @transform_0, window_bounds = array<i64: 16, 32>}, {transform_indices = @transform_1, window_bounds = array<i64: 32, 96>}, {transform_indices = @transform_2, window_bounds = array<i64: 1, 96>}, {transform_indices = @transform_3, window_bounds = array<i64: 16, 96>}]} {
    %c0_i32 = arith.constant 0 : i32
    %0 = arith.cmpi eq, %arg2, %c0_i32 : i32
    %1 = arith.extui %0 : i1 to i32
    %c0_i32_0 = arith.constant 0 : i32
    %2 = arith.cmpi ne, %1, %c0_i32_0 : i32
    scf.if %2 {
      %cst_10 = arith.constant 0.000000e+00 : f32
      %12 = vector.broadcast %cst_10 : f32 to vector<16x96xf32>
      %c0_11 = arith.constant 0 : index
      %c0_12 = arith.constant 0 : index
      %13 = vector.load %arg7[%c0_11, %c0_12] : memref<16x96xf32, #tpu.memory_space<vmem>>, vector<16x96xf32>
      tpu.vector_store %arg7[%c0_11, %c0_12], %12 {strides = array<i32>} : memref<16x96xf32, #tpu.memory_space<vmem>>, vector<16x96xf32>,
    } else {
    }
    %c0 = arith.constant 0 : index
    %c0_1 = arith.constant 0 : index
    %3 = vector.load %arg7[%c0, %c0_1] : memref<16x96xf32, #tpu.memory_space<vmem>>, vector<16x96xf32>
    %c0_2 = arith.constant 0 : index
    %c0_3 = arith.constant 0 : index
    %4 = vector.load %arg3[%c0_2, %c0_3] : memref<16x32xf32, #tpu.memory_space<vmem>>, vector<16x32xf32>
    %c0_4 = arith.constant 0 : index
    %c0_5 = arith.constant 0 : index
    %5 = vector.load %arg4[%c0_4, %c0_5] : memref<32x96xf32, #tpu.memory_space<vmem>>, vector<32x96xf32>
    %cst = arith.constant dense<0.000000e+00> : vector<16x96xf32>
    %6 = tpu.matmul %4, %5, %cst {dimension_numbers = #tpu.dot_dimension_numbers<[1], [0], [0], [1], [0, 0, 1, 1], [], []>} : vector<16x32xf32>, vector<32x96xf32>, vector<16x96xf32> -> vector<16x96xf32>
    %7 = arith.addf %3, %6 : vector<16x96xf32>
    %c0_6 = arith.constant 0 : index
    %c0_7 = arith.constant 0 : index
    %8 = vector.load %arg7[%c0_6, %c0_7] : memref<16x96xf32, #tpu.memory_space<vmem>>, vector<16x96xf32>
    tpu.vector_store %arg7[%c0_6, %c0_7], %7 {strides = array<i32>} : memref<16x96xf32, #tpu.memory_space<vmem>>, vector<16x96xf32>,
    %c0_i32_8 = arith.constant 0 : i32
    %9 = arith.cmpi eq, %arg2, %c0_i32_8 : i32
    %10 = arith.extui %9 : i1 to i32
    %c0_i32_9 = arith.constant 0 : i32
    %11 = arith.cmpi ne, %10, %c0_i32_9 : i32
    scf.if %11 {
      %c0_10 = arith.constant 0 : index
      %c0_11 = arith.constant 0 : index
      %12 = vector.load %arg7[%c0_10, %c0_11] : memref<16x96xf32, #tpu.memory_space<vmem>>, vector<16x96xf32>
      %c0_12 = arith.constant 0 : index
      %c0_13 = arith.constant 0 : index
      %13 = vector.load %arg5[%c0_12, %c0_13] : memref<1x96xf32, #tpu.memory_space<vmem>>, vector<1x96xf32>
      %14 = vector.broadcast %13 : vector<1x96xf32> to vector<16x96xf32>
      %15 = arith.addf %12, %14 : vector<16x96xf32>
      %c0_14 = arith.constant 0 : index
      %c0_15 = arith.constant 0 : index
      %16 = vector.load %arg6[%c0_14, %c0_15] : memref<16x96xf32, #tpu.memory_space<vmem>>, vector<16x96xf32>
      tpu.vector_store %arg6[%c0_14, %c0_15], %15 {strides = array<i32>} : memref<16x96xf32, #tpu.memory_space<vmem>>, vector<16x96xf32>,
    } else {
    }
    return
  }
  func.func @transform_0(%arg0: i32, %arg1: i32, %arg2: i32) -> (i32, i32) {
    %c0_i32 = arith.constant 0 : i32
    return %arg0, %arg2 : i32, i32
  }
  func.func @transform_1(%arg0: i32, %arg1: i32, %arg2: i32) -> (i32, i32) {
    %c0_i32 = arith.constant 0 : i32
    return %arg2, %arg1 : i32, i32
  }
  func.func @transform_2(%arg0: i32, %arg1: i32, %arg2: i32) -> (i32, i32) {
    %c0_i32 = arith.constant 0 : i32
    %c0_i32_0 = arith.constant 0 : i32
    return %c0_i32, %arg1 : i32, i32
  }
  func.func @transform_3(%arg0: i32, %arg1: i32, %arg2: i32) -> (i32, i32) {
    %c0_i32 = arith.constant 0 : i32
    return %arg0, %arg1 : i32, i32
  }
}

</mosaic_0001>

<bundles_post_ra>
// kernel: tpu_custom_call.1
= control target key start
LH: loop header
LB: loop body
LE: loop exit
PB: predicated region body
PF: predicated region fallthrough
CT: control target
= control target key end

     0   :  { %8 = vsyncpa [#allocation4], 0  ;;  %s326_s0 = inlined_call_operand.hbm [shape: f32[16,32], index: 0, kind: input, shape index: {}]   ;;  %s327_s1 = inlined_call_operand.hbm [shape: f32[32,96], index: 1, kind: input, shape index: {}]   ;;  %s328_s2 = inlined_call_operand.vmem [shape: f32[1,96], index: 2, kind: input, shape index: {}]   ;;  %s329_s3 = inlined_call_operand.hbm [shape: f32[16,96], index: 3, kind: output, shape index: {}]  }
   0x1   :  { %9 = vsyncpa [#allocation7], 0 }
   0x2   :  { %10 = vsyncpa [#allocation5], 0  ;;  %s271_s12 = smov [#allocation3]  }
   0x3   :  { %s16_s13 = sshll.u32 %s271_s12, 4  ;;  %s17_s13 = int_to_ptr.vmem [resolvable:$true] %s16_s13 }
   0x4   :  { %s213_s14 = scalar_lea.vmem %s17_s13, 256  ;;  %p218_p1 = scmp.lt.s32.totalorder %s17_s13, %s17_s13 }
   0x5   :  { %p214_p0 = scmp.ne.s32.totalorder %s17_s13, %s213_s14  ;;  %p219_p2 = scmp.lt.s32.totalorder %s213_s14, %s213_s14 }
   0x7   :  { %p220_p3 = por %p219_p2, %p218_p1 }
   0x9   :  { %p221_p4 = pnand %p220_p3, %p214_p0 }
   0xb   :  { %224 = shalt.err (!%p221_p4)
}
   0xc   :  { %s272_s15 = smov 128   ;;  %s273_s16 = smov 8  }
   0xd   :  { %22 = dma.hbm_to_vmem [thread:$0]  %s326_s0, 256, %s17_s13, [#allocation4], %s272_s15, %s272_s15, %s273_s16  }
   0xe   :  { %s274_s19 = smov [#allocation6]  }
   0xf   :  { %s28_s20 = sshll.u32 %s274_s19, 4  ;;  %s29_s20 = int_to_ptr.vmem [resolvable:$true] %s28_s20 }
  0x10   :  { %s233_s21 = scalar_lea.vmem %s29_s20, 512  ;;  %p238_p6 = scmp.lt.s32.totalorder %s29_s20, %s29_s20 }
  0x11   :  { %p234_p5 = scmp.ne.s32.totalorder %s29_s20, %s233_s21  ;;  %p239_p7 = scmp.lt.s32.totalorder %s233_s21, %s233_s21 }
  0x13   :  { %p240_p8 = por %p239_p7, %p238_p6 }
  0x15   :  { %p241_p9 = pnand %p240_p8, %p234_p5 }
  0x17   :  { %244 = shalt.err (!%p241_p9)
}
  0x18   :  { %34 = dma.hbm_to_vmem [thread:$0]  %s327_s1, 512, %s29_s20, [#allocation7], %s272_s15, %s272_s15, %s273_s16  }
  0x19   :  { %265 = dma.done.wait [#allocation4], 256  }
  0x1a   :  { %266 = vsyncadd [#allocation4], 4294967040 }
  0x1b   :  { %267 = dma.done.wait [#allocation7], 512  }
  0x1c   :  { %268 = vsyncadd [#allocation7], 4294966784  ;;  %vm47_vm0 = vcmask 785408   ;;  %v275_v0 = vmov 0.0   ;;  %vm58_vm1 = vcmask 261120   ;;  %v57_v1 = vld [vmem:[#allocation6 + $0x18] sm:$0xff] }
  0x1d   :  { %49 = vst.msk [vmem:[#allocation2 + $0x8] sm:$0xff] %vm47_vm0, %v275_v0  ;;  %48 = vst.msk [vmem:[#allocation2] sm:$0xff] %vm47_vm0, %v275_v0  ;;  %v56_v2 = vld [vmem:[#allocation6 + $0x10] sm:$0xff]  ;;  %188 = vmatprep.subr.mxu0 %v57_v1  ;;  %v55_v4 = vld [vmem:[#allocation6 + $0x8] sm:$0xff]  ;;  %s276_s24 = smov [#allocation8]  }
  0x1e   :  { %v52_v3 = vld [vmem:[#allocation3] sm:$0xff]  ;;  %189 = vmatpush3.msra.mxu0 %v57_v1  ;;  %v54_v5 = vld [vmem:[#allocation6] sm:$0xff]  ;;  %v53_v6 = vld [vmem:[#allocation3 + $0x8] sm:$0xff]  ;;  %s166_s25 = sshll.u32 %s276_s24, 4  ;;  %s167_s25 = int_to_ptr.vmem [resolvable:$true] %s166_s25 }
  0x1f   :  { %196 = vmatprep.mubr.msk.f32.mxu0 %vm58_vm1, %v52_v3  ;;  %190 = vmatprep.subr.mxu0 %v56_v2  ;;  %v181_v13 = vld [vmem:[%s328_s2] ss:$0 sm:$0xff]  ;;  %s245_s26 = scalar_lea.vmem %s167_s25, 256  ;;  %p250_p11 = scmp.lt.s32.totalorder %s167_s25, %s167_s25 }
  0x20   :  { %191 = vmatpush3.msra.mxu0 %v56_v2  ;;  %p246_p10 = scmp.ne.s32.totalorder %s167_s25, %s245_s26  ;;  %p251_p12 = scmp.lt.s32.totalorder %s245_s26, %s245_s26 }
  0x21   :  { %192 = vmatprep.subr.mxu0 %v55_v4 }
  0x22   :  { %193 = vmatpush3.msra.mxu0 %v55_v4  ;;  %p252_p13 = por %p251_p12, %p250_p11 }
  0x23   :  { %194 = vmatprep.subr.mxu0 %v54_v5 }
  0x24   :  { %195 = vmatpush3.msra.mxu0 %v54_v5  ;;  %v51_v7 = vld [vmem:[#allocation2 + $0x8] sm:$0xff]  ;;  %v50_v9 = vld [vmem:[#allocation2] sm:$0xff]  ;;  %p253_p0 = pnand %p252_p13, %p246_p10 }
  0x25   :  { %197 = vmatmul.mubr.msk.f32.vlgmr.msra.gmra.mxu0 %vm58_vm1, %v53_v6 }
  0xe5   :  { %v198_v8 = vpop.f32.mrf.mxu0 }
  0xe6   :  { %v141_v10 = vadd.f32 %v198_v8, %v51_v7 }
  0xe7   :  { %v131_v11 = vpop.f32.mrf.mxu0 }
  0xe8   :  { %144 = vst.msk [vmem:[#allocation2 + $0x8] sm:$0xff] %vm47_vm0, %v141_v10  ;;  %v140_v12 = vadd.f32 %v131_v11, %v50_v9 }
  0xea   :  { %143 = vst.msk [vmem:[#allocation2] sm:$0xff] %vm47_vm0, %v140_v12 }
  0xef   :  { %v149_v14 = vld [vmem:[#allocation2 + $0x8] sm:$0xff] }
  0xf0   :  { %v158_v15 = vadd.f32 %v181_v13, %v149_v14 }
  0xf1   :  { %v148_v16 = vld [vmem:[#allocation2] sm:$0xff] }
  0xf2   :  { %v157_v17 = vadd.f32 %v181_v13, %v148_v16  ;;  %160 = vst.msk [vmem:[#allocation8 + $0x8] sm:$0xff] %vm47_vm0, %v158_v15 }
  0xf4   :  { %159 = vst.msk [vmem:[#allocation8] sm:$0xff] %vm47_vm0, %v157_v17 }
  0xf5   :  { %256 = shalt.err (!%p253_p0)
}
  0xf6   :  { %172 = dma.vmem_to_hbm [thread:$0]  %s167_s25, 256, %s329_s3, [#allocation5], %s272_s15, %s272_s15, %s273_s16  }
  0xf7   :  { %269 = dma.done.wait [#allocation5], 256  }
  0xf8   :  { %270 = vsyncadd [#allocation5], 4294967040 }
  0xf9   :  { %176 = vsyncpa [#allocation4], 1 }
  0xfa   :  { %177 = vsyncpa [#allocation7], 1 }
  0xfb   :  { %178 = vsyncpa [#allocation5], 1 }

</bundles_post_ra>
